<compile_context>
chip_gen: v7x
topology: tpu7x:2x2x1
jax: 0.10.0
libtpu: 0.0.40
codegen_flags: <defaults>
</compile_context>

<pallas_src>
import jax
import jax.numpy as jnp
from jax.experimental import pallas as pl
from jax.experimental.pallas import tpu as pltpu

# ---- LIF default parameters (norse.torch.functional.lif.LIFParameters) ----
TAU_SYN_INV = 200.0   # 1 / 5e-3
TAU_MEM_INV = 100.0   # 1 / 1e-2
V_LEAK = 0.0
V_TH = 1.0
V_RESET = 0.0
DT = 1e-3
DV_COEFF = DT * TAU_MEM_INV   # 0.1
DI_COEFF = DT * TAU_SYN_INV   # 0.2

# Constant spike value of the module forward (auto-init state: v=V_LEAK, i=0).
_V_DECAYED_INIT = V_LEAK + DV_COEFF * ((V_LEAK - V_LEAK) + 0.0)   # == 0.0
_Z_INIT = 1.0 if (_V_DECAYED_INIT - V_TH) > 0.0 else 0.0          # == 0.0 (strict >)

# Per-buffer block-size targets (bytes).
_FWD_TARGET_BLOCK_BYTES = 2 << 20     # 1 blocked output stream  -> <= ~4 MiB of VMEM
_STEP_TARGET_BLOCK_BYTES = 512 << 10  # 6 blocked streams (3 in + 3 out) -> <= ~6 MiB


def _batch_tile(n_batch: int, per_batch_elems: int, itemsize: int, target_bytes: int) -> int:
    """Batch entries per block: ~target_bytes per buffer, at least 1, at most n_batch."""
    per_batch_bytes = max(per_batch_elems * itemsize, 1)
    nb = max(1, target_bytes // per_batch_bytes)
    return min(n_batch, nb)


# ----------------------- module-forward kernel (auto-init state) -----------------------
def _norse_forward_kernel(x_hbm_ref, o_ref):
    # With the auto-initialised state, v_decayed = 0 < V_TH = 1, so the returned spike
    # tensor is a constant.  x only feeds the *discarded* new state, so it is
    # intentionally never read; with memory_space=pl.ANY no DMA / VMEM double-buffer is
    # generated for it (the previous version still streamed it from HBM).
    del x_hbm_ref
    o_ref[...] = jnp.full(o_ref.shape, _Z_INIT, dtype=o_ref.dtype)


def norse_stateful_forward(data):
    """NorseStatefulModel.forward: (N, C, H, W) -> spikes of the same shape/dtype."""
    assert data.ndim == 4, "module forward expects NCHW input"
    n, c, h, w = data.shape
    nb = _batch_tile(n, c * h * w, data.dtype.itemsize, _FWD_TARGET_BLOCK_BYTES)
    grid = (pl.cdiv(n, nb),)
    # Full-extent trailing dims (C, H, W) are exempt from the (8,128) divisibility rule,
    # so the original array is blocked directly -- no pad / unpad HBM round trips.
    out_spec = pl.BlockSpec((nb, c, h, w), lambda b: (b, 0, 0, 0))
    return pl.pallas_call(
        _norse_forward_kernel,
        out_shape=jax.ShapeDtypeStruct(data.shape, data.dtype),
        grid=grid,
        in_specs=[pl.BlockSpec(memory_space=pl.ANY)],  # unread: no auto-DMA generated
        out_specs=out_spec,
        compiler_params=pltpu.CompilerParams(dimension_semantics=("parallel",)),
    )(data)


# ------------------ full ReLU + LIF step (provided per-element state) ------------------
def _relu_lif_step_kernel(x_ref, v_ref, i_ref, z_ref, v_new_ref, i_new_ref):
    x = jnp.maximum(x_ref[...].astype(jnp.float32), 0.0)        # relu1
    v = v_ref[...].astype(jnp.float32)
    i = i_ref[...].astype(jnp.float32)
    i_decayed = i - DI_COEFF * i
    v_decayed = v + DV_COEFF * ((V_LEAK - v) + i)
    z = (v_decayed - V_TH > 0.0).astype(jnp.float32)            # heaviside (strict >)
    z_ref[...] = z.astype(z_ref.dtype)
    v_new_ref[...] = ((1.0 - z) * v_decayed + z * V_RESET).astype(v_new_ref.dtype)
    i_new_ref[...] = (i_decayed + x).astype(i_new_ref.dtype)


def relu_lif_step(data, v, i, *, spike_dtype=jnp.float32):
    """ReLU + one LIF Euler step over an explicit per-element state.

    Returns (z, v_new, i_new).  This is the non-constant-folded form of the module's
    arithmetic; use it if the LIF state is persisted across calls.  spike_dtype may be
    bf16: spikes are exactly {0,1}, so the cast is lossless and saves HBM bytes at scale.
    """
    assert data.shape == v.shape == i.shape and data.ndim == 4
    n, c, h, w = data.shape
    nb = _batch_tile(n, c * h * w, 4, _STEP_TARGET_BLOCK_BYTES)
    grid = (pl.cdiv(n, nb),)
    spec = pl.BlockSpec((nb, c, h, w), lambda b: (b, 0, 0, 0))
    return pl.pallas_call(
        _relu_lif_step_kernel,
        out_shape=(
            jax.ShapeDtypeStruct(data.shape, spike_dtype),
            jax.ShapeDtypeStruct(data.shape, jnp.float32),
            jax.ShapeDtypeStruct(data.shape, jnp.float32),
        ),
        grid=grid,
        in_specs=[spec, spec, spec],
        out_specs=(spec, spec, spec),
        compiler_params=pltpu.CompilerParams(dimension_semantics=("parallel",)),
    )(data, v, i)


# ----------------------------- pure-JAX references -----------------------------
def _reference_forward(data):
    """NorseStatefulModel.forward in pure JAX (relu -> LIF step, auto-init state)."""
    _ = jnp.maximum(data, 0.0)                   # feeds only the discarded new state
    v = jnp.full_like(data, V_LEAK)
    i = jnp.zeros_like(data)
    v_decayed = v + DV_COEFF * ((V_LEAK - v) + i)
    return (v_decayed - V_TH > 0.0).astype(data.dtype)


def _reference_step(data, v, i):
    x = jnp.maximum(data, 0.0)
    i_decayed = i - DI_COEFF * i
    v_decayed = v + DV_COEFF * ((V_LEAK - v) + i)
    z = (v_decayed - V_TH > 0.0).astype(jnp.float32)
    v_new = (1.0 - z) * v_decayed + z * V_RESET
    i_new = i_decayed + x
    return z, v_new, i_new


if __name__ == "__main__":
    key_data, key_x, key_v, key_i = jax.random.split(jax.random.PRNGKey(0), 4)

    # 1) Module forward at its declared size: batch=1, input_type=(2, 28, 28).
    data = jax.random.normal(key_data, (1, 2, 28, 28), dtype=jnp.float32)
    out = jax.block_until_ready(norse_stateful_forward(data))
    assert out.shape == data.shape and out.dtype == data.dtype
    assert jnp.array_equal(out, _reference_forward(data)), "forward mismatch vs reference"

    # 2) Full relu + LIF step with a non-trivial state: non-vacuous check of the
    #    arithmetic the default forward constant-folds away.
    shape = (2, 4, 16, 16)
    x_s = jax.random.normal(key_x, shape, dtype=jnp.float32)
    v_s = 2.0 * jax.random.normal(key_v, shape, dtype=jnp.float32)
    i_s = 2.0 * jax.random.normal(key_i, shape, dtype=jnp.float32)
    z, v_new, i_new = jax.block_until_ready(relu_lif_step(x_s, v_s, i_s))
    z_ref, v_ref, i_ref = _reference_step(x_s, v_s, i_s)
    assert jnp.array_equal(z, z_ref), "LIF spike mismatch"
    assert jnp.allclose(v_new, v_ref, atol=1e-6), "LIF v_new mismatch"
    assert jnp.allclose(i_new, i_ref, atol=1e-6), "LIF i_new mismatch"
    assert float(jnp.sum(z)) > 0.0, "state test produced no spikes; check is vacuous"

    print("KERNEL_OK")
</pallas_src>

<mosaic_0001>
module attributes {stable_mosaic.version = 11 : i64} {
  func.func @_norse_forward_kernel(%arg0: i32, %arg1: memref<1x2x28x28xf32, #tpu.memory_space<any>>, %arg2: memref<1x2x28x28xf32, #tpu.memory_space<vmem>>) attributes {dimension_semantics = [#tpu.dimension_semantics<parallel>], iteration_bounds = array<i64: 1>, scalar_prefetch = 0 : i64, scratch_operands = 0 : i64, tpu.core_type = #tpu.core_type<tc>, window_params = [{}, {transform_indices = @transform_1, window_bounds = array<i64: 1, 2, 28, 28>}]} {
    %cst = arith.constant 0.000000e+00 : f32
    %0 = vector.broadcast %cst : f32 to vector<1x2x28x28xf32>
    %c0 = arith.constant 0 : index
    %c0_0 = arith.constant 0 : index
    %c0_1 = arith.constant 0 : index
    %c0_2 = arith.constant 0 : index
    %1 = vector.load %arg2[%c0, %c0_0, %c0_1, %c0_2] : memref<1x2x28x28xf32, #tpu.memory_space<vmem>>, vector<1x2x28x28xf32>
    tpu.vector_store %arg2[%c0, %c0_0, %c0_1, %c0_2], %0 {strides = array<i32>} : memref<1x2x28x28xf32, #tpu.memory_space<vmem>>, vector<1x2x28x28xf32>,
    return
  }
  func.func @transform_1(%arg0: i32) -> (i32, i32, i32, i32) {
    %c0_i32 = arith.constant 0 : i32
    %c0_i32_0 = arith.constant 0 : i32
    %c0_i32_1 = arith.constant 0 : i32
    %c0_i32_2 = arith.constant 0 : i32
    return %arg0, %c0_i32, %c0_i32_0, %c0_i32_1 : i32, i32, i32, i32
  }
}

</mosaic_0001>

<bundles_post_ra>
// kernel: tpu_custom_call.1
= control target key start
LH: loop header
LB: loop body
LE: loop exit
PB: predicated region body
PF: predicated region fallthrough
CT: control target
= control target key end

     0   :  { %vm6_vm0 = vcmask 228352   ;;  %vm10_vm1 = vcmask 224256   ;;  %v21_v0 = vmov 0.0   ;;  %s56_s0 = inlined_call_operand.vmem [shape: f32[1,2,28,28], index: 0, kind: input, shape index: {}]   ;;  %s57_s1 = inlined_call_operand.vmem [shape: f32[1,2,28,28], index: 1, kind: output, shape index: {}]  }
   0x1   :  { %7 = vst.msk [vmem:[%s57_s1] sm:$0xff] %vm6_vm0, %v21_v0  ;;  %8 = vst.msk [vmem:[%s57_s1 + $0x8] sm:$0xff] %vm6_vm0, %v21_v0 }
   0x2   :  { %9 = vst.msk [vmem:[%s57_s1 + $0x10] sm:$0xff] %vm6_vm0, %v21_v0  ;;  %12 = vst.msk [vmem:[%s57_s1 + $0x20] sm:$0xff] %vm6_vm0, %v21_v0 }
   0x3   :  { %13 = vst.msk [vmem:[%s57_s1 + $0x28] sm:$0xff] %vm6_vm0, %v21_v0  ;;  %14 = vst.msk [vmem:[%s57_s1 + $0x30] sm:$0xff] %vm6_vm0, %v21_v0 }
   0x4   :  { %11 = vst.msk [vmem:[%s57_s1 + $0x18] sm:$0xf] %vm10_vm1, %v21_v0  ;;  %15 = vst.msk [vmem:[%s57_s1 + $0x38] sm:$0xf] %vm10_vm1, %v21_v0 }

</bundles_post_ra>
